<compile_context>
chip_gen: v7x
topology: tpu7x:2x2x1
jax: 0.10.0
libtpu: 0.0.40
codegen_flags: <defaults>
</compile_context>

<pallas_src>
import jax
import jax.numpy as jnp
from jax.experimental import pallas as pl
from jax.experimental.pallas import tpu as pltpu


LANE = 128


def _rup(n, m=LANE):
    return ((n + m - 1) // m) * m


# ---------------------------------------------------------------------------
# Pallas kernels
# ---------------------------------------------------------------------------
def gcn3_kernel(a_ref, x_ref, w_ref, b_ref, o_ref):
    """One grid step = one augmented view:  o = ReLU(A_norm @ (X @ W) + b).

    a_ref: [Np, Np] bf16 (pre-normalized adjacency, zero-padded)
    x_ref: [Np, Fp] bf16,  w_ref: [Fp, Hp] bf16,  b_ref: [1, Hp] f32
    o_ref: [Np, Hp] f32
    """
    xw = jnp.dot(x_ref[...], w_ref[...], preferred_element_type=jnp.float32)
    z = jnp.dot(a_ref[...], xw.astype(jnp.bfloat16),
                preferred_element_type=jnp.float32)
    o_ref[...] = jnp.maximum(z + b_ref[...], 0.0)


def project_kernel(z_ref, w1_ref, b1_ref, w2_ref, b2_ref, o_ref):
    """Encoder.project:  fc2( ELU( fc1(z) ) )  -- fused, single block."""
    h = jnp.dot(z_ref[...], w1_ref[...],
                preferred_element_type=jnp.float32) + b1_ref[...]
    h = jnp.where(h > 0.0, h, jnp.exp(h) - 1.0)          # ELU(alpha=1), f32
    o_ref[...] = jnp.dot(h.astype(jnp.bfloat16), w2_ref[...],
                         preferred_element_type=jnp.float32) + b2_ref[...]


# ---------------------------------------------------------------------------
# pallas_call wrappers
# ---------------------------------------------------------------------------
def gcn_forward_batched(a_norm3, x3, w, b):
    """a_norm3: [V, N, N] f32, x3: [V, N, F] f32, w: [F, H], b: [1, H]."""
    V, N, _ = a_norm3.shape
    F = x3.shape[-1]
    H = w.shape[1]
    Np, Fp, Hp = _rup(N), _rup(F), _rup(H)

    a_p = jnp.pad(a_norm3, ((0, 0), (0, Np - N), (0, Np - N))).astype(jnp.bfloat16)
    x_p = jnp.pad(x3, ((0, 0), (0, Np - N), (0, Fp - F))).astype(jnp.bfloat16)
    w_p = jnp.pad(w, ((0, Fp - F), (0, Hp - H))).astype(jnp.bfloat16)
    b_p = jnp.pad(b, ((0, 0), (0, Hp - H)))                      # stays f32

    flops = 2 * V * (Np * Fp * Hp + Np * Np * Hp)
    bytes_accessed = (a_p.size + x_p.size + w_p.size) * 2 + b_p.size * 4 \
                     + V * Np * Hp * 4

    out = pl.pallas_call(
        gcn3_kernel,
        out_shape=jax.ShapeDtypeStruct((V, Np, Hp), jnp.float32),
        grid=(V,),
        in_specs=[
            pl.BlockSpec((pl.Squeezed(), Np, Np), lambda v: (v, 0, 0)),
            pl.BlockSpec((pl.Squeezed(), Np, Fp), lambda v: (v, 0, 0)),
            pl.BlockSpec((Fp, Hp), lambda v: (0, 0)),   # shared weights
            pl.BlockSpec((1, Hp), lambda v: (0, 0)),    # shared bias
        ],
        out_specs=pl.BlockSpec((pl.Squeezed(), Np, Hp), lambda v: (v, 0, 0)),
        compiler_params=pltpu.CompilerParams(
            dimension_semantics=("parallel",)),
        cost_estimate=pl.CostEstimate(flops=flops, transcendentals=0,
                                      bytes_accessed=bytes_accessed),
    )(a_p, x_p, w_p, b_p)
    return out[:, :N, :H]


def project_forward(z, w1, b1, w2, b2):
    N, H = z.shape
    P = w1.shape[1]
    Np, Hp, Pp = _rup(N), _rup(H), _rup(P)

    z_p = jnp.pad(z, ((0, Np - N), (0, Hp - H))).astype(jnp.bfloat16)
    w1_p = jnp.pad(w1, ((0, Hp - H), (0, Pp - P))).astype(jnp.bfloat16)
    b1_p = jnp.pad(b1, ((0, 0), (0, Pp - P)))
    w2_p = jnp.pad(w2, ((0, Pp - P), (0, Hp - H))).astype(jnp.bfloat16)
    b2_p = jnp.pad(b2, ((0, 0), (0, Hp - H)))

    vmem = lambda: pl.BlockSpec(memory_space=pltpu.MemorySpace.VMEM)
    flops = 2 * (Np * Hp * Pp + Np * Pp * Hp)
    bytes_accessed = (z_p.size + w1_p.size + w2_p.size) * 2 \
                     + (b1_p.size + b2_p.size) * 4 + Np * Hp * 4

    out = pl.pallas_call(
        project_kernel,
        out_shape=jax.ShapeDtypeStruct((Np, Hp), jnp.float32),
        in_specs=[vmem(), vmem(), vmem(), vmem(), vmem()],
        out_specs=vmem(),
        cost_estimate=pl.CostEstimate(flops=flops, transcendentals=Np * Pp,
                                      bytes_accessed=bytes_accessed),
    )(z_p, w1_p, b1_p, w2_p, b2_p)
    return out[:N, :H]


# ---------------------------------------------------------------------------
# Glue: augmentors, normalized dense adjacency, parameter init
# ---------------------------------------------------------------------------
def normalized_adj(edge_index, edge_weight, num_nodes):
    """D^-1/2 (A + I) D^-1/2 built once per view, outside the kernel."""
    src, dst = edge_index[0], edge_index[1]
    a = jnp.zeros((num_nodes, num_nodes), jnp.float32).at[dst, src].add(edge_weight)
    a = a + jnp.eye(num_nodes, dtype=jnp.float32)
    deg = jnp.sum(a, axis=-1, keepdims=True)
    d_inv_sqrt = jnp.where(deg > 0.0, jax.lax.rsqrt(deg), 0.0)
    return d_inv_sqrt * a * d_inv_sqrt.reshape(1, num_nodes)


def feature_masking_aug(x, edge_index, edge_weight, *, key, keep_prob=0.7):
    mask = jax.random.bernoulli(key, keep_prob, (x.shape[1],)).astype(x.dtype)
    return x * mask[None, :], edge_index, edge_weight


def edge_dropping_aug(x, edge_index, edge_weight, *, key, keep_prob=0.7):
    mask = jax.random.bernoulli(key, keep_prob,
                                (edge_weight.shape[0],)).astype(edge_weight.dtype)
    return x, edge_index, edge_weight * mask


def init_params(key, f_in, hidden_dim, proj_dim):
    ks = jax.random.split(key, 3)
    scale = 0.1
    return {
        "enc_w": scale * jax.random.normal(ks[0], (f_in, hidden_dim), jnp.float32),
        "enc_b": jnp.zeros((1, hidden_dim), jnp.float32),
        "fc1_w": scale * jax.random.normal(ks[1], (hidden_dim, proj_dim), jnp.float32),
        "fc1_b": jnp.zeros((1, proj_dim), jnp.float32),
        "fc2_w": scale * jax.random.normal(ks[2], (proj_dim, hidden_dim), jnp.float32),
        "fc2_b": jnp.zeros((1, hidden_dim), jnp.float32),
    }


@jax.jit
def encoder_forward(params, x, edge_index, edge_weight):
    """Mirrors Encoder.forward -> (z, z1, z2); one pallas_call for all views."""
    n = x.shape[0]
    x1, ei1, ew1 = feature_masking_aug(x, edge_index, edge_weight,
                                       key=jax.random.PRNGKey(101))
    x2, ei2, ew2 = edge_dropping_aug(x, edge_index, edge_weight,
                                     key=jax.random.PRNGKey(202))
    a_all = jnp.stack([
        normalized_adj(edge_index, edge_weight, n),
        normalized_adj(ei1, ew1, n),
        normalized_adj(ei2, ew2, n),
    ])                                            # [3, N, N]
    x_all = jnp.stack([x, x1, x2])                # [3, N, F]
    z_all = gcn_forward_batched(a_all, x_all, params["enc_w"], params["enc_b"])
    return z_all[0], z_all[1], z_all[2]


@jax.jit
def encoder_project(params, z):
    """Mirrors Encoder.project."""
    return project_forward(z, params["fc1_w"], params["fc1_b"],
                           params["fc2_w"], params["fc2_b"])


# ---------------------------------------------------------------------------
if __name__ == "__main__":
    N, F_IN, HIDDEN, PROJ, E = 16, 32, 32, 16, 40

    key = jax.random.PRNGKey(0)
    k_x, k_src, k_dst, k_p = jax.random.split(key, 4)

    x = jax.random.normal(k_x, (N, F_IN), jnp.float32)
    src = jax.random.randint(k_src, (E,), 0, N)
    dst = jax.random.randint(k_dst, (E,), 0, N)
    edge_index = jnp.stack([src, dst], axis=0)              # [2, E]
    edge_weight = jnp.ones((E,), jnp.float32)

    params = init_params(k_p, F_IN, HIDDEN, PROJ)

    z, z1, z2 = encoder_forward(params, x, edge_index, edge_weight)
    p = encoder_project(params, z)

    jax.block_until_ready((z, z1, z2, p))
    assert z.shape == (N, HIDDEN) and z1.shape == (N, HIDDEN) and z2.shape == (N, HIDDEN)
    assert p.shape == (N, HIDDEN)
    print("KERNEL_OK")
</pallas_src>

<mosaic_0001>
module attributes {stable_mosaic.version = 11 : i64} {
  func.func @gcn3_kernel(%arg0: i32, %arg1: memref<1x128x128xbf16, #tpu.memory_space<vmem>>, %arg2: memref<1x128x128xbf16, #tpu.memory_space<vmem>>, %arg3: memref<128x128xbf16, #tpu.memory_space<vmem>>, %arg4: memref<1x128xf32, #tpu.memory_space<vmem>>, %arg5: memref<1x128x128xf32, #tpu.memory_space<vmem>>) attributes {dimension_semantics = [#tpu.dimension_semantics<parallel>], iteration_bounds = array<i64: 3>, scalar_prefetch = 0 : i64, scratch_operands = 0 : i64, tpu.core_type = #tpu.core_type<tc>, window_params = [{transform_indices = @transform_0, window_bounds = array<i64: 1, 128, 128>}, {transform_indices = @transform_1, window_bounds = array<i64: 1, 128, 128>}, {pipeline_mode = #tpu.pipeline_mode<synchronous>, transform_indices = @transform_2, window_bounds = array<i64: 128, 128>}, {pipeline_mode = #tpu.pipeline_mode<synchronous>, transform_indices = @transform_3, window_bounds = array<i64: 1, 128>}, {transform_indices = @transform_4, window_bounds = array<i64: 1, 128, 128>}]} {
    %c0 = arith.constant 0 : index
    %c0_0 = arith.constant 0 : index
    %c0_1 = arith.constant 0 : index
    %0 = vector.load %arg2[%c0, %c0_0, %c0_1] : memref<1x128x128xbf16, #tpu.memory_space<vmem>>, vector<1x128x128xbf16>
    %1 = vector.shape_cast %0 : vector<1x128x128xbf16> to vector<128x128xbf16>
    %c0_2 = arith.constant 0 : index
    %c0_3 = arith.constant 0 : index
    %2 = vector.load %arg3[%c0_2, %c0_3] : memref<128x128xbf16, #tpu.memory_space<vmem>>, vector<128x128xbf16>
    %cst = arith.constant dense<0.000000e+00> : vector<128x128xf32>
    %3 = tpu.matmul %1, %2, %cst {dimension_numbers = #tpu.dot_dimension_numbers<[1], [0], [0], [1], [0, 0, 1, 1], [], []>} : vector<128x128xbf16>, vector<128x128xbf16>, vector<128x128xf32> -> vector<128x128xf32>
    %c0_4 = arith.constant 0 : index
    %c0_5 = arith.constant 0 : index
    %c0_6 = arith.constant 0 : index
    %4 = vector.load %arg1[%c0_4, %c0_5, %c0_6] : memref<1x128x128xbf16, #tpu.memory_space<vmem>>, vector<1x128x128xbf16>
    %5 = vector.shape_cast %4 : vector<1x128x128xbf16> to vector<128x128xbf16>
    %6 = arith.truncf %3 : vector<128x128xf32> to vector<128x128xbf16>
    %cst_7 = arith.constant dense<0.000000e+00> : vector<128x128xf32>
    %7 = tpu.matmul %5, %6, %cst_7 {dimension_numbers = #tpu.dot_dimension_numbers<[1], [0], [0], [1], [0, 0, 1, 1], [], []>} : vector<128x128xbf16>, vector<128x128xbf16>, vector<128x128xf32> -> vector<128x128xf32>
    %c0_8 = arith.constant 0 : index
    %c0_9 = arith.constant 0 : index
    %8 = vector.load %arg4[%c0_8, %c0_9] : memref<1x128xf32, #tpu.memory_space<vmem>>, vector<1x128xf32>
    %9 = vector.broadcast %8 : vector<1x128xf32> to vector<128x128xf32>
    %10 = arith.addf %7, %9 : vector<128x128xf32>
    %cst_10 = arith.constant 0.000000e+00 : f32
    %11 = vector.broadcast %cst_10 : f32 to vector<128x128xf32>
    %12 = arith.maximumf %10, %11 : vector<128x128xf32>
    %c0_11 = arith.constant 0 : index
    %c0_12 = arith.constant 0 : index
    %c0_13 = arith.constant 0 : index
    %13 = vector.load %arg5[%c0_11, %c0_12, %c0_13] : memref<1x128x128xf32, #tpu.memory_space<vmem>>, vector<1x128x128xf32>
    %14 = vector.shape_cast %13 : vector<1x128x128xf32> to vector<128x128xf32>
    %15 = vector.shape_cast %12 : vector<128x128xf32> to vector<1x128x128xf32>
    tpu.vector_store %arg5[%c0_11, %c0_12, %c0_13], %15 {strides = array<i32>} : memref<1x128x128xf32, #tpu.memory_space<vmem>>, vector<1x128x128xf32>,
    return
  }
  func.func @transform_0(%arg0: i32) -> (i32, i32, i32) {
    %c0_i32 = arith.constant 0 : i32
    %c0_i32_0 = arith.constant 0 : i32
    %c0_i32_1 = arith.constant 0 : i32
    return %arg0, %c0_i32, %c0_i32_0 : i32, i32, i32
  }
  func.func @transform_1(%arg0: i32) -> (i32, i32, i32) {
    %c0_i32 = arith.constant 0 : i32
    %c0_i32_0 = arith.constant 0 : i32
    %c0_i32_1 = arith.constant 0 : i32
    return %arg0, %c0_i32, %c0_i32_0 : i32, i32, i32
  }
  func.func @transform_2(%arg0: i32) -> (i32, i32) {
    %c0_i32 = arith.constant 0 : i32
    %c0_i32_0 = arith.constant 0 : i32
    %c0_i32_1 = arith.constant 0 : i32
    return %c0_i32, %c0_i32_0 : i32, i32
  }
  func.func @transform_3(%arg0: i32) -> (i32, i32) {
    %c0_i32 = arith.constant 0 : i32
    %c0_i32_0 = arith.constant 0 : i32
    %c0_i32_1 = arith.constant 0 : i32
    return %c0_i32, %c0_i32_0 : i32, i32
  }
  func.func @transform_4(%arg0: i32) -> (i32, i32, i32) {
    %c0_i32 = arith.constant 0 : i32
    %c0_i32_0 = arith.constant 0 : i32
    %c0_i32_1 = arith.constant 0 : i32
    return %arg0, %c0_i32, %c0_i32_0 : i32, i32, i32
  }
}

</mosaic_0001>

<bundles_post_ra>
// kernel: encoder_forward.1
= control target key start
LH: loop header
LB: loop body
LE: loop exit
PB: predicated region body
PF: predicated region fallthrough
CT: control target
= control target key end

     0   :  { %s921_s15 = smov 0   ;;  %s1014_s0 = inlined_call_operand.vmem [shape: bf16[3,128,128], index: 0, kind: input, shape index: {}]   ;;  %s1015_s1 = inlined_call_operand.vmem [shape: bf16[3,128,128], index: 1, kind: input, shape index: {}]   ;;  %s1016_s2 = inlined_call_operand.vmem [shape: bf16[128,128], index: 2, kind: input, shape index: {}]   ;;  %s1017_s3 = inlined_call_operand.vmem [shape: f32[1,128], index: 3, kind: input, shape index: {}]   ;;  %s1018_s4 = inlined_call_operand.vmem [shape: f32[3,128,128], index: 4, kind: output, shape index: {}]  }
   0x1 LB: > { %s719_s16 = sadd.s32 4294967295, %s894_s15   ;;  %p723_p0 = scmp.ge.s32.totalorder %s894_s15, 1  ;;  %s894_s15 = sphi %s921_s15, %s14_s15  }
   0x2   : > { %p172_p1 = scmp.lt.s32.totalorder %s894_s15, 4 }
   0x4   : > { %p173_p2 = pnand %p723_p0, %p172_p1 }
   0x5   : > { %v864_v0 = vld [vmem:[%s1016_s2] sm:$0xff] (!%p173_p2)   ;;  %p203_p3 = scmp.lt.s32.totalorder (!%p173_p2), %s719_s16, 2  ;;  %v865_v1 = vld [vmem:[%s1016_s2 + $0x8] sm:$0xff] (!%p173_p2)   ;;  %v866_v2 = vld [vmem:[%s1016_s2 + $0x10] sm:$0xff] (!%p173_p2)  }
   0x6   : > { %176 = sbr.rel (%p173_p2) target bundleno = 531 (0x213), region = 36  ;;  %792 = vmatprep.subr.bf16.mxu0 (!%p173_p2), %v864_v0  ;;  %v867_v3 = vld [vmem:[%s1016_s2 + $0x18] sm:$0xff] (!%p173_p2)   ;;  %v868_v5 = vld [vmem:[%s1016_s2 + $0x20] sm:$0xff] (!%p173_p2)   ;;  %v869_v6 = vld [vmem:[%s1016_s2 + $0x28] sm:$0xff] (!%p173_p2)  }
   0x7   : > { %793 = vmatpush3.bf16.msra.mxu0 (!%p173_p2), %v864_v0  ;;  %v870_v7 = vld [vmem:[%s1016_s2 + $0x30] sm:$0xff] (!%p173_p2)   ;;  %v871_v8 = vld [vmem:[%s1016_s2 + $0x38] sm:$0xff] (!%p173_p2)   ;;  %v746_v48 = vld [vmem:[%s1017_s3] ss:$0 sm:$0xff] (!%p173_p2) }
   0x8   : > { %794 = vmatprep.subr.bf16.mxu0 (!%p173_p2), %v865_v1 }
   0xb   : > { %795 = vmatpush3.bf16.msra.mxu0 (!%p173_p2), %v865_v1 }
   0xc   : > { %796 = vmatprep.subr.bf16.mxu0 (!%p173_p2), %v866_v2 }
   0xd   : > { %s1020_s16 = smov (!%p203_p3, %s719_s16), 2 }
   0xe   : > { %s757_s23 = sshll.u32 %s1020_s16, 6  ;;  %s759_s18 = sshll.u32 %s1020_s16, 7 }
   0xf   : > { %s946_s26 = scalar_lea.vmem %s1015_s1, %s757_s23  ;;  %797 = vmatpush3.bf16.msra.mxu0 %v866_v2  ;;  %s976_s13 = scalar_lea.vmem %s1014_s0, %s757_s23 }
  0x10   : > { %v872_v4 = vld [vmem:[%s946_s26] sm:$0xff]   ;;  %798 = vmatprep.subr.bf16.mxu0 %v867_v3  ;;  %v873_v9 = vld [vmem:[%s946_s26 + $0x8] sm:$0xff]   ;;  %v874_v10 = vld [vmem:[%s946_s26 + $0x10] sm:$0xff]   ;;  %s993_s21 = scalar_lea.vmem %s1018_s4, %s759_s18 }
  0x11   : > { %808 = vmatprep.mubr.bf16.mxu0 %v872_v4  ;;  %v875_v11 = vld [vmem:[%s946_s26 + $0x18] sm:$0xff]   ;;  %v876_v12 = vld [vmem:[%s946_s26 + $0x20] sm:$0xff]   ;;  %v877_v13 = vld [vmem:[%s946_s26 + $0x28] sm:$0xff]  }
  0x12   : > { %v878_v14 = vld [vmem:[%s946_s26 + $0x30] sm:$0xff]   ;;  %v879_v15 = vld [vmem:[%s946_s26 + $0x38] sm:$0xff]   ;;  %v880_v16 = vld [vmem:[%s976_s13] sm:$0xff]  }
  0x13   : > { %799 = vmatpush3.bf16.msra.mxu0 %v867_v3  ;;  %840 = vmatprep.mubr.bf16.mxu1 %v880_v16  ;;  %v881_v41 = vld [vmem:[%s976_s13 + $0x8] sm:$0xff]   ;;  %v882_v42 = vld [vmem:[%s976_s13 + $0x10] sm:$0xff]   ;;  %v883_v43 = vld [vmem:[%s976_s13 + $0x18] sm:$0xff]  }
  0x14   : > { %800 = vmatprep.subr.bf16.mxu0 %v868_v5  ;;  %v884_v44 = vld [vmem:[%s976_s13 + $0x20] sm:$0xff]   ;;  %v885_v45 = vld [vmem:[%s976_s13 + $0x28] sm:$0xff]   ;;  %v886_v46 = vld [vmem:[%s976_s13 + $0x30] sm:$0xff]  }
  0x15   : > { %v887_v47 = vld [vmem:[%s976_s13 + $0x38] sm:$0xff]  }
  0x17   : > { %801 = vmatpush3.bf16.msra.mxu0 %v868_v5 }
  0x18   : > { %802 = vmatprep.subr.bf16.mxu0 %v869_v6 }
  0x1b   : > { %803 = vmatpush3.bf16.msra.mxu0 %v869_v6 }
  0x1c   : > { %804 = vmatprep.subr.bf16.mxu0 %v870_v7 }
  0x1f   : > { %805 = vmatpush3.bf16.msra.mxu0 %v870_v7 }
  0x20   : > { %806 = vmatprep.subr.bf16.mxu0 %v871_v8 }
  0x23   : > { %807 = vmatpush3.bf16.msra.mxu0 %v871_v8 }
  0x26   : > { %809 = vmatmul.mubr.bf16.vlgmr.msra.gmra.mrb[0].mxu0 %v873_v9 }
  0x27   : > { %812 = vmatprep.mubr.bf16.mxu0 %v874_v10 }
  0x2e   : > { %813 = vmatmul.mubr.bf16.gmra.mrb[4].mxu0 %v875_v11 }
  0x2f   : > { %816 = vmatprep.mubr.bf16.mxu0 %v876_v12 }
  0x36   : > { %817 = vmatmul.mubr.bf16.gmra.mrb[8].mxu0 %v877_v13 }
  0x37   : > { %820 = vmatprep.mubr.bf16.mxu0 %v878_v14 }
  0x3e   : > { %821 = vmatmul.mubr.bf16.gmra.mrb[12].mxu0 %v879_v15 }
  0xf9   : > { %v810_v17 = vpop.f32.mrb[0].mxu0 }
  0xfa   : > { %v381_v18 = vpop.f32.mrb[1].mxu0 }
  0xfb   : > { %v811_v19 = vpop.f32.mrb[2].mxu0 }
  0xfc   : > { %v461_v20 = vpack.c.bf16 %v811_v19, %v810_v17  ;;  %v384_v21 = vpop.f32.mrb[3].mxu0 }
  0xfd   : > { %v460_v22 = vpack.c.bf16 %v384_v21, %v381_v18 }
  0xff   : > { %824 = vmatprep.subr.bf16.mxu1 %v460_v22 }
 0x100   : > { %825 = vmatpush3.bf16.msra.mxu1 %v460_v22 }
 0x101   : > { %v814_v23 = vpop.f32.mrb[4].mxu0  ;;  %826 = vmatprep.subr.bf16.mxu1 %v461_v20 }
 0x102   : > { %v397_v24 = vpop.f32.mrb[5].mxu0 }
 0x103   : > { %v815_v25 = vpop.f32.mrb[6].mxu0 }
 0x104   : > { %v463_v26 = vpack.c.bf16 %v815_v25, %v814_v23  ;;  %v400_v27 = vpop.f32.mrb[7].mxu0  ;;  %827 = vmatpush3.bf16.msra.mxu1 %v461_v20 }
 0x105   : > { %v462_v28 = vpack.c.bf16 %v400_v27, %v397_v24 }
 0x107   : > { %828 = vmatprep.subr.bf16.mxu1 %v462_v28 }
 0x108   : > { %829 = vmatpush3.bf16.msra.mxu1 %v462_v28 }
 0x109   : > { %v818_v29 = vpop.f32.mrb[8].mxu0  ;;  %830 = vmatprep.subr.bf16.mxu1 %v463_v26 }
 0x10a   : > { %v413_v30 = vpop.f32.mrb[9].mxu0 }
 0x10b   : > { %v819_v31 = vpop.f32.mrb[10].mxu0 }
 0x10c   : > { %v465_v32 = vpack.c.bf16 %v819_v31, %v818_v29  ;;  %v416_v33 = vpop.f32.mrb[11].mxu0  ;;  %831 = vmatpush3.bf16.msra.mxu1 %v463_v26 }
 0x10d   : > { %v464_v34 = vpack.c.bf16 %v416_v33, %v413_v30 }
 0x10f   : > { %832 = vmatprep.subr.bf16.mxu1 %v464_v34 }
 0x110   : > { %833 = vmatpush3.bf16.msra.mxu1 %v464_v34 }
 0x111   : > { %v822_v35 = vpop.f32.mrb[12].mxu0  ;;  %834 = vmatprep.subr.bf16.mxu1 %v465_v32 }
 0x112   : > { %v429_v36 = vpop.f32.mrb[13].mxu0 }
 0x113   : > { %v823_v37 = vpop.f32.mrb[14].mxu0 }
 0x114   : > { %v467_v38 = vpack.c.bf16 %v823_v37, %v822_v35  ;;  %v432_v39 = vpop.f32.mrb[15].mxu0  ;;  %835 = vmatpush3.bf16.msra.mxu1 %v465_v32 }
 0x115   : > { %v466_v40 = vpack.c.bf16 %v432_v39, %v429_v36 }
 0x117   : > { %836 = vmatprep.subr.bf16.mxu1 %v466_v40 }
 0x118   : > { %837 = vmatpush3.bf16.msra.mxu1 %v466_v40 }
 0x119   : > { %838 = vmatprep.subr.bf16.mxu1 %v467_v38 }
 0x11c   : > { %839 = vmatpush3.bf16.msra.mxu1 %v467_v38 }
 0x11f   : > { %841 = vmatmul.mubr.bf16.vlgmr.msra.gmra.mrb[0].mxu1 %v881_v41 }
 0x120   : > { %844 = vmatprep.mubr.bf16.mxu1 %v882_v42 }
 0x127   : > { %845 = vmatmul.mubr.bf16.gmra.mrb[4].mxu1 %v883_v43 }
 0x128   : > { %848 = vmatprep.mubr.bf16.mxu1 %v884_v44 }
 0x12f   : > { %849 = vmatmul.mubr.bf16.gmra.mrb[8].mxu1 %v885_v45 }
 0x130   : > { %852 = vmatprep.mubr.bf16.mxu1 %v886_v46 }
 0x137   : > { %853 = vmatmul.mubr.bf16.gmra.mrb[12].mxu1 %v887_v47 }
 0x1f2   : > { %v842_v49 = vpop.f32.mrb[0].mxu1 }
 0x1f3   : > { %v566_v50 = vadd.f32 %v842_v49, %v746_v48  ;;  %v557_v51 = vpop.f32.mrb[1].mxu1 }
 0x1f4   : > { %v558_v52 = vadd.f32 %v746_v48, %v557_v51  ;;  %v843_v53 = vpop.f32.mrb[2].mxu1 }
 0x1f5   : > { %v622_v54 = vmax.f32 %v566_v50, 0.0  ;;  %v569_v55 = vadd.f32 %v843_v53, %v746_v48  ;;  %v560_v56 = vpop.f32.mrb[3].mxu1 }
 0x1f6   : > { %v620_v57 = vmax.f32 %v558_v52, 0.0  ;;  %v561_v58 = vadd.f32 %v746_v48, %v560_v56 }
 0x1f7   : > { %638 = vst [vmem:[%s993_s21 + $0x10] sm:$0xff] %v622_v54  ;;  %v623_v59 = vmax.f32 %v569_v55, 0.0 }
 0x1f8   : > { %636 = vst [vmem:[%s993_s21] sm:$0xff] %v620_v57  ;;  %v621_v60 = vmax.f32 %v561_v58, 0.0 }
 0x1f9   : > { %639 = vst [vmem:[%s993_s21 + $0x18] sm:$0xff] %v623_v59 }
 0x1fa   : > { %637 = vst [vmem:[%s993_s21 + $0x8] sm:$0xff] %v621_v60  ;;  %v846_v61 = vpop.f32.mrb[4].mxu1 }
 0x1fb   : > { %v582_v62 = vadd.f32 %v846_v61, %v746_v48  ;;  %v573_v63 = vpop.f32.mrb[5].mxu1 }
 0x1fc   : > { %v574_v0 = vadd.f32 %v746_v48, %v573_v63  ;;  %v847_v1 = vpop.f32.mrb[6].mxu1 }
 0x1fd   : > { %v626_v2 = vmax.f32 %v582_v62, 0.0  ;;  %v585_v3 = vadd.f32 %v847_v1, %v746_v48  ;;  %v576_v4 = vpop.f32.mrb[7].mxu1 }
 0x1fe   : > { %v624_v5 = vmax.f32 %v574_v0, 0.0  ;;  %v577_v6 = vadd.f32 %v746_v48, %v576_v4 }
 0x1ff   : > { %642 = vst [vmem:[%s993_s21 + $0x30] sm:$0xff] %v626_v2  ;;  %v627_v7 = vmax.f32 %v585_v3, 0.0 }
 0x200   : > { %640 = vst [vmem:[%s993_s21 + $0x20] sm:$0xff] %v624_v5  ;;  %v625_v8 = vmax.f32 %v577_v6, 0.0 }
 0x201   : > { %643 = vst [vmem:[%s993_s21 + $0x38] sm:$0xff] %v627_v7 }
 0x202   : > { %641 = vst [vmem:[%s993_s21 + $0x28] sm:$0xff] %v625_v8  ;;  %v850_v9 = vpop.f32.mrb[8].mxu1 }
 0x203   : > { %v598_v10 = vadd.f32 %v850_v9, %v746_v48  ;;  %v589_v11 = vpop.f32.mrb[9].mxu1 }
 0x204   : > { %v590_v12 = vadd.f32 %v746_v48, %v589_v11  ;;  %v851_v13 = vpop.f32.mrb[10].mxu1 }
 0x205   : > { %v630_v14 = vmax.f32 %v598_v10, 0.0  ;;  %v601_v15 = vadd.f32 %v851_v13, %v746_v48  ;;  %v592_v16 = vpop.f32.mrb[11].mxu1 }
 0x206   : > { %v628_v17 = vmax.f32 %v590_v12, 0.0  ;;  %v593_v18 = vadd.f32 %v746_v48, %v592_v16 }
 0x207   : > { %646 = vst [vmem:[%s993_s21 + $0x50] sm:$0xff] %v630_v14  ;;  %v631_v19 = vmax.f32 %v601_v15, 0.0 }
 0x208   : > { %644 = vst [vmem:[%s993_s21 + $0x40] sm:$0xff] %v628_v17  ;;  %v629_v20 = vmax.f32 %v593_v18, 0.0 }
 0x209   : > { %647 = vst [vmem:[%s993_s21 + $0x58] sm:$0xff] %v631_v19 }
 0x20a   : > { %645 = vst [vmem:[%s993_s21 + $0x48] sm:$0xff] %v629_v20  ;;  %v854_v21 = vpop.f32.mrb[12].mxu1 }
 0x20b   : > { %v614_v22 = vadd.f32 %v854_v21, %v746_v48  ;;  %v605_v23 = vpop.f32.mrb[13].mxu1 }
 0x20c   : > { %v606_v24 = vadd.f32 %v746_v48, %v605_v23  ;;  %v855_v25 = vpop.f32.mrb[14].mxu1 }
 0x20d   : > { %v634_v26 = vmax.f32 %v614_v22, 0.0  ;;  %v617_v27 = vadd.f32 %v855_v25, %v746_v48  ;;  %v608_v28 = vpop.f32.mrb[15].mxu1 }
 0x20e   : > { %v632_v29 = vmax.f32 %v606_v24, 0.0  ;;  %v609_v30 = vadd.f32 %v746_v48, %v608_v28 }
 0x20f   : > { %650 = vst [vmem:[%s993_s21 + $0x70] sm:$0xff] %v634_v26  ;;  %v635_v31 = vmax.f32 %v617_v27, 0.0 }
 0x210   : > { %648 = vst [vmem:[%s993_s21 + $0x60] sm:$0xff] %v632_v29  ;;  %v633_v32 = vmax.f32 %v609_v30, 0.0 }
 0x211   : > { %651 = vst [vmem:[%s993_s21 + $0x78] sm:$0xff] %v635_v31 }
 0x212   : > { %649 = vst [vmem:[%s993_s21 + $0x68] sm:$0xff] %v633_v32 }
 0x213 PF: > { %s14_s15 = sadd.s32 1, %s894_s15  }
 0x214   : > { %p11_p4 = scmp.ge.s32.totalorder %s14_s15, 5  }
 0x216   :  { %13 = sbr.rel (!%p11_p4) target bundleno = 1 (0x1), region = 69 }

</bundles_post_ra>
